<compile_context>
chip_gen: v5e
topology: v5e:2x2
jax: 0.10.0
libtpu: 0.0.40
codegen_flags: <defaults>
</compile_context>

<pallas_src>
import functools

import jax
import jax.numpy as jnp
from jax.experimental import pallas as pl
from jax.experimental.pallas import tpu as pltpu


def _round_up(x: int, m: int) -> int:
    return ((x + m - 1) // m) * m


def _vmem_limit_bytes() -> int:
    """Scoped-VMEM request with ~25% headroom (96 MiB v5e/v6e, 48 MiB v7x)."""
    try:
        cap = int(getattr(pltpu.get_tpu_info(), "vmem_capacity_bytes", 64 << 20))
    except Exception:
        cap = 64 << 20
    return (cap * 3) // 4


def _linear_kernel(x_ref, w_ref, b_ref, o_ref):
    # x_ref: (TILE_M, H)     activation row tile (double-buffered)
    # w_ref: (H, C_pad)      pre-transposed weight, VMEM-resident (single buffer)
    # b_ref: (1, C_pad)      bias row, VMEM-resident (single buffer)
    # o_ref: (TILE_M, C_pad) lane-dense output tile
    acc = jnp.dot(x_ref[...], w_ref[...], preferred_element_type=jnp.float32)
    o_ref[...] = (acc + b_ref[...].astype(jnp.float32)).astype(o_ref.dtype)


@functools.partial(jax.jit, static_argnames=("tile_m",))
def classification_head(x, weight, bias, *, tile_m: int = 512):
    """y = x @ weight.T + bias  (PyTorch nn.Linear forward).

    x:      (..., H)
    weight: (C, H)   -- PyTorch layout
    bias:   (C,)
    """
    *lead, hidden = x.shape
    num_classes = weight.shape[0]

    x2d = x.reshape(-1, hidden)                      # (M, H) — a view, no HBM copy
    m = x2d.shape[0]

    # ---- static layout / tiling decisions ---------------------------------
    xb = jnp.dtype(x.dtype).itemsize
    wb = jnp.dtype(weight.dtype).itemsize
    pack = max(8, 32 // xb)                          # sublane packing: 8 f32 / 16 bf16 / 32 i8
    c_pad = _round_up(num_classes, 128)              # lane-dense class dim

    vmem_limit = _vmem_limit_bytes()
    weight_bytes = c_pad * hidden * wb               # single-buffered (Buffered(1))
    bias_bytes = c_pad * max(wb, 4)
    slack = 2 << 20                                  # Mosaic internal scratch headroom
    per_row = 2 * (hidden + c_pad) * xb              # double-buffered x tile + out tile
    avail = vmem_limit - weight_bytes - bias_bytes - slack
    if avail >= per_row * pack:
        cap_rows = max(pack, (avail // per_row) // pack * pack)
    else:
        cap_rows = pack                              # see TODO(synk) above

    tm = min(tile_m, cap_rows, _round_up(m, pack))
    half = _round_up(-(-m // 2), pack)               # ceil(m/2) rounded to packing
    if half >= 256:
        # Enough rows that splitting still keeps >=256-row tiles: guarantee
        # grid >= 2 so both v7x TensorCores get work (no-op cost on v5e/v6e).
        tm = min(tm, half)
    tm = max(pack, (tm // pack) * pack)
    grid_m = -(-m // tm)                             # cdiv; partial last block is masked

    # ---- one-time parameter prep (weight/bias only; x is untouched) -------
    w_t = jnp.pad(weight, ((0, c_pad - num_classes), (0, 0))).T      # (H, C_pad)
    b_p = jnp.pad(bias, (0, c_pad - num_classes)).reshape(1, c_pad)  # (1, C_pad)

    cost = pl.CostEstimate(
        flops=2 * m * hidden * c_pad,
        bytes_accessed=(m * hidden + c_pad * hidden + m * c_pad) * xb,
        transcendentals=0,
    )

    out2d = pl.pallas_call(
        _linear_kernel,
        out_shape=jax.ShapeDtypeStruct((m, c_pad), x.dtype),
        grid=(grid_m,),
        in_specs=[
            pl.BlockSpec((tm, hidden), lambda i: (i, 0)),            # x row tile
            pl.BlockSpec((hidden, c_pad), lambda i: (0, 0),          # weight (resident)
                         pipeline_mode=pl.Buffered(1)),
            pl.BlockSpec((1, c_pad), lambda i: (0, 0),               # bias (resident)
                         pipeline_mode=pl.Buffered(1)),
        ],
        out_specs=pl.BlockSpec((tm, c_pad), lambda i: (i, 0)),
        compiler_params=pltpu.CompilerParams(
            dimension_semantics=("parallel",),
            vmem_limit_bytes=vmem_limit,
        ),
        cost_estimate=cost,
    )(x2d, w_t, b_p)

    out2d = out2d[:, :num_classes]                    # drop padded class columns
    return out2d.reshape(*lead, num_classes)


def init_linear_params(key, hidden_size, num_classes, dtype=jnp.float32):
    """Deterministic init mimicking nn.Linear default (uniform ±1/sqrt(H))."""
    kw, kb = jax.random.split(key)
    bound = 1.0 / (hidden_size ** 0.5)
    weight = jax.random.uniform(
        kw, (num_classes, hidden_size), dtype=dtype, minval=-bound, maxval=bound
    )
    bias = jax.random.uniform(
        kb, (num_classes,), dtype=dtype, minval=-bound, maxval=bound
    )
    return weight, bias


if __name__ == "__main__":
    # Small, module-consistent shapes: batch=2, seq=8, hidden=32, classes=16.
    batch, seq, hidden, num_classes = 2, 8, 32, 16

    key = jax.random.PRNGKey(0)
    kx, kp = jax.random.split(key)

    x = jax.random.normal(kx, (batch, seq, hidden), dtype=jnp.float32)
    weight, bias = init_linear_params(kp, hidden, num_classes)

    y = classification_head(x, weight, bias)
    y = jax.block_until_ready(y)

    # Reference check (plain JAX == nn.Linear semantics).
    y_ref = x @ weight.T + bias
    assert y.shape == (batch, seq, num_classes)
    assert jnp.allclose(y, y_ref, atol=1e-5, rtol=1e-5), "mismatch vs reference"

    print("KERNEL_OK")
</pallas_src>

<mosaic_0001>
module attributes {stable_mosaic.version = 11 : i64} {
  func.func @_linear_kernel(%arg0: i32, %arg1: memref<16x32xf32, #tpu.memory_space<vmem>>, %arg2: memref<32x128xf32, #tpu.memory_space<vmem>>, %arg3: memref<1x128xf32, #tpu.memory_space<vmem>>, %arg4: memref<16x128xf32, #tpu.memory_space<vmem>>) attributes {dimension_semantics = [#tpu.dimension_semantics<parallel>], iteration_bounds = array<i64: 1>, scalar_prefetch = 0 : i64, scratch_operands = 0 : i64, tpu.core_type = #tpu.core_type<tc>, window_params = [{transform_indices = @transform_0, window_bounds = array<i64: 16, 32>}, {pipeline_mode = #tpu.pipeline_mode<synchronous>, transform_indices = @transform_1, window_bounds = array<i64: 32, 128>}, {pipeline_mode = #tpu.pipeline_mode<synchronous>, transform_indices = @transform_2, window_bounds = array<i64: 1, 128>}, {transform_indices = @transform_3, window_bounds = array<i64: 16, 128>}]} {
    %c0 = arith.constant 0 : index
    %c0_0 = arith.constant 0 : index
    %0 = vector.load %arg1[%c0, %c0_0] : memref<16x32xf32, #tpu.memory_space<vmem>>, vector<16x32xf32>
    %c0_1 = arith.constant 0 : index
    %c0_2 = arith.constant 0 : index
    %1 = vector.load %arg2[%c0_1, %c0_2] : memref<32x128xf32, #tpu.memory_space<vmem>>, vector<32x128xf32>
    %cst = arith.constant dense<0.000000e+00> : vector<16x128xf32>
    %2 = tpu.matmul %0, %1, %cst {dimension_numbers = #tpu.dot_dimension_numbers<[1], [0], [0], [1], [0, 0, 1, 1], [], []>} : vector<16x32xf32>, vector<32x128xf32>, vector<16x128xf32> -> vector<16x128xf32>
    %c0_3 = arith.constant 0 : index
    %c0_4 = arith.constant 0 : index
    %3 = vector.load %arg3[%c0_3, %c0_4] : memref<1x128xf32, #tpu.memory_space<vmem>>, vector<1x128xf32>
    %4 = vector.broadcast %3 : vector<1x128xf32> to vector<16x128xf32>
    %5 = arith.addf %2, %4 : vector<16x128xf32>
    %c0_5 = arith.constant 0 : index
    %c0_6 = arith.constant 0 : index
    %6 = vector.load %arg4[%c0_5, %c0_6] : memref<16x128xf32, #tpu.memory_space<vmem>>, vector<16x128xf32>
    tpu.vector_store %arg4[%c0_5, %c0_6], %5 {strides = array<i32>} : memref<16x128xf32, #tpu.memory_space<vmem>>, vector<16x128xf32>,
    return
  }
  func.func @transform_0(%arg0: i32) -> (i32, i32) {
    %c0_i32 = arith.constant 0 : i32
    %c0_i32_0 = arith.constant 0 : i32
    return %arg0, %c0_i32 : i32, i32
  }
  func.func @transform_1(%arg0: i32) -> (i32, i32) {
    %c0_i32 = arith.constant 0 : i32
    %c0_i32_0 = arith.constant 0 : i32
    %c0_i32_1 = arith.constant 0 : i32
    return %c0_i32, %c0_i32_0 : i32, i32
  }
  func.func @transform_2(%arg0: i32) -> (i32, i32) {
    %c0_i32 = arith.constant 0 : i32
    %c0_i32_0 = arith.constant 0 : i32
    %c0_i32_1 = arith.constant 0 : i32
    return %c0_i32, %c0_i32_0 : i32, i32
  }
  func.func @transform_3(%arg0: i32) -> (i32, i32) {
    %c0_i32 = arith.constant 0 : i32
    %c0_i32_0 = arith.constant 0 : i32
    return %arg0, %c0_i32 : i32, i32
  }
}

</mosaic_0001>

<bundles_post_ra>
// kernel: classification_head.1
= control target key start
LH: loop header
LB: loop body
LE: loop exit
PB: predicated region body
PF: predicated region fallthrough
CT: control target
= control target key end

     0   :  { %vm24_vm0 = vcmask 261120   ;;  %s114_s1 = inlined_call_operand.vmem [shape: f32[32,128], index: 1, kind: input, shape index: {}]   ;;  %s115_s2 = inlined_call_operand.vmem [shape: f32[1,128], index: 2, kind: input, shape index: {}]   ;;  %s116_s0 = inlined_call_operand.vmem [shape: f32[16,32], index: 0, kind: input, shape index: {}]   ;;  %s117_s3 = inlined_call_operand.vmem [shape: f32[16,128], index: 3, kind: output, shape index: {}]  }
   0x1   :  { %v19_v0 = vld [vmem:[%s114_s1 + $0x18] sm:$0xff]  ;;  %v18_v1 = vld [vmem:[%s114_s1 + $0x10] sm:$0xff]  ;;  %v17_v2 = vld [vmem:[%s114_s1 + $0x8] sm:$0xff] }
   0x2   :  { %43 = vmatpush.msra.mxu0 %v19_v0  ;;  %62 = vmatpush.msra.mxu1 %v19_v0  ;;  %v16_v3 = vld [vmem:[%s114_s1] sm:$0xff]  ;;  %v15_v5 = vld [vmem:[%s116_s0 + $0x8] sm:$0xff] }
   0x3   :  { %v14_v4 = vld [vmem:[%s116_s0] sm:$0xff] }
   0x4   :  { %44 = vmatpush.msra.mxu0 %v18_v1  ;;  %63 = vmatpush.msra.mxu1 %v18_v1  ;;  %v66_v6 = vld [vmem:[%s115_s2] ss:$0 sm:$0xff] }
   0x6   :  { %45 = vmatpush.msra.mxu0 %v17_v2  ;;  %64 = vmatpush.msra.mxu1 %v17_v2 }
   0x8   :  { %46 = vmatpush.msra.mxu0 %v16_v3  ;;  %65 = vmatpush.msra.mxu1 %v16_v3 }
   0x9   :  { %60 = vmatmul.msk.f32.vlgmr.msra.gmra.mxu0 %vm24_vm0, %v14_v4  ;;  %61 = vmatmul.msk.f32.vlgmr.msra.gmra.mxu1 %vm24_vm0, %v15_v5 }
  0x86   :  { %v48_v7 = vpop.f32.mrf.mxu0  ;;  %v51_v8 = vpop.f32.mrf.mxu1 }
  0x87   :  { %v49_v9 = vadd.f32 %v66_v6, %v48_v7  ;;  %v52_v10 = vadd.f32 %v66_v6, %v51_v8 }
  0x89   :  { %54 = vst [vmem:[%s117_s3] sm:$0xff] %v49_v9 }
  0x8a   :  { %55 = vst [vmem:[%s117_s3 + $0x8] sm:$0xff] %v52_v10 }

</bundles_post_ra>
